<compile_context>
chip_gen: v7x
topology: tpu7x:2x2x1
jax: 0.10.0
libtpu: 0.0.40
codegen_flags: <defaults>
</compile_context>

<pallas_src>
import math

import jax
import jax.numpy as jnp
from jax.experimental import pallas as pl
from jax.experimental.pallas import tpu as pltpu

BN_EPS = 1e-5
_HALF_PI = math.pi / 2.0

_IN_DIMS = (6, 8, 10, 6, 8, 10)
_IN_OFFS = (0, 6, 14, 24, 30, 38)   # K-offsets inside the 48-wide activation / weight
_N_PER_HEAD = 8
_D_IN = 24                           # raw input width (t0|t1|t2)
_D_ACT = 48                          # [x, trig(x)]
_MAX_ROW_TILE = 16384                # keeps lane-padded double buffers < ~36 MiB (v7x-safe)


def _stats_kernel(x_ref, w_ref, o_ref):
    """Per-tile [sum; sum_sq] of z = x @ W24 (heads 0..2 pre-BN activations, bias folded)."""
    z = jnp.dot(x_ref[...], w_ref[...], preferred_element_type=jnp.float32)  # (tb, 24)
    o_ref[:, 0:1, :] = jnp.sum(z, axis=0, keepdims=True)[None]
    o_ref[:, 1:2, :] = jnp.sum(z * z, axis=0, keepdims=True)[None]


def _apply_kernel(x_ref, w_ref, ss_ref, o_ref):
    """Fused 48-wide matmul + per-lane affine (BN scale/shift or linear bias) + sigmoid."""
    xb = x_ref[...]                                               # (tb, 24) f32
    lane = jax.lax.broadcasted_iota(jnp.int32, (1, _D_IN), 1)
    amp = jnp.where(lane >= 14, 0.5, 1.0).astype(jnp.float32)     # sin(0.5*t2) lanes
    phs = jnp.where(jnp.logical_and(lane >= 6, lane < 14),
                    _HALF_PI, 0.0).astype(jnp.float32)            # cos(t1) = sin(t1 + pi/2)
    trig = jnp.sin(xb * amp + phs)                                # one EUP pass for all heads
    act = jnp.concatenate([xb, trig], axis=1)                     # (tb, 48)
    y = jnp.dot(act, w_ref[...], preferred_element_type=jnp.float32)
    scale = ss_ref[0:1, :]
    shift = ss_ref[1:2, :]
    o_ref[...] = jax.nn.sigmoid(y * scale + shift).astype(o_ref.dtype)


def _pack_params(params):
    """Pack the 18 per-head parameters into a few arrays (built once, outside the kernels)."""
    w48 = jnp.zeros((_D_ACT, _D_ACT), jnp.float32)
    for h, (din, off) in enumerate(zip(_IN_DIMS, _IN_OFFS)):
        w48 = w48.at[off:off + din,
                     _N_PER_HEAD * h:_N_PER_HEAD * (h + 1)].set(
            params[f"w{h}"].astype(jnp.float32))
    w24 = w48[:_D_IN, :_D_IN]                                     # heads 0..2 block

    gamma24 = jnp.concatenate(
        [params[f"g{j}"].reshape(-1).astype(jnp.float32) for j in range(3)])
    beta24 = jnp.concatenate(
        [params[f"be{j}"].reshape(-1).astype(jnp.float32) for j in range(3)])
    bias_tail = jnp.concatenate(
        [params[f"b{h}"].reshape(-1).astype(jnp.float32) for h in (3, 4, 5)])
    return w48, w24, gamma24, beta24, bias_tail


def _choose_row_tile(batch: int, max_rows: int) -> int:
    max_rows = min(int(max_rows), _MAX_ROW_TILE)
    max_rows = max(8, (max_rows // 8) * 8)          # sublane-aligned
    b_aligned = ((batch + 7) // 8) * 8
    return min(max_rows, b_aligned)


def mymodule2_forward(x, params, *, max_rows_per_tile=8192, concat_heads=True):
    """x: (B, 24) float32. Returns (6*B, 8) float32 matching MyModule2.forward."""
    B = x.shape[0]
    x = x.astype(jnp.float32)
    w48, w24, gamma24, beta24, bias_tail = _pack_params(params)

    tb = _choose_row_tile(B, max_rows_per_tile)
    nt = pl.cdiv(B, tb)
    b_pad = nt * tb
    if b_pad != B:
        # Zero rows contribute exactly 0 to the stats (no bias/constant in the stats path).
        x = jnp.pad(x, ((0, b_pad - B), (0, 0)))

    # x/out blocks are lane-padded to 128 in VMEM: ~512 B/row each, double-buffered.
    vmem_limit = int(min(max(32 << 20, 4 * tb * 512 + (4 << 20)), 64 << 20))
    cparams = pltpu.CompilerParams(
        dimension_semantics=("parallel",),
        vmem_limit_bytes=vmem_limit,
    )

    # ---- Pass 1: per-tile BN partial sums (slim 24-lane path, no trig, no bias). ----
    partials = pl.pallas_call(
        _stats_kernel,
        out_shape=jax.ShapeDtypeStruct((nt, 2, _D_IN), jnp.float32),
        grid=(nt,),
        in_specs=[
            pl.BlockSpec((tb, _D_IN), lambda r: (r, 0)),
            pl.BlockSpec((_D_IN, _D_IN), lambda r: (0, 0)),
        ],
        out_specs=pl.BlockSpec((1, 2, _D_IN), lambda r: (r, 0, 0)),
        compiler_params=cparams,
    )(x, w24)

    # ---- Tiny wrapper reduction: batch stats -> per-lane scale/shift (2, 48). ----
    s = jnp.sum(partials, axis=0)                        # (2, 24)
    inv_n = 1.0 / B                                      # real batch size (padding excluded)
    mu = s[0] * inv_n
    var = jnp.maximum(s[1] * inv_n - mu * mu, 0.0)       # biased variance (training-mode BN)
    scale_bn = gamma24 * jax.lax.rsqrt(var + BN_EPS)
    shift_bn = beta24 - mu * scale_bn
    scale = jnp.concatenate([scale_bn, jnp.ones((_D_IN,), jnp.float32)])
    shift = jnp.concatenate([shift_bn, bias_tail])       # b3..b5 folded into the shift
    ss = jnp.stack([scale, shift], axis=0)               # (2, 48)

    # ---- Pass 2: fused matmul + affine + sigmoid, lane-dense (tb, 48) output. ----
    out48 = pl.pallas_call(
        _apply_kernel,
        out_shape=jax.ShapeDtypeStruct((b_pad, _D_ACT), jnp.float32),
        grid=(nt,),
        in_specs=[
            pl.BlockSpec((tb, _D_IN), lambda r: (r, 0)),
            pl.BlockSpec((_D_ACT, _D_ACT), lambda r: (0, 0)),
            pl.BlockSpec((2, _D_ACT), lambda r: (0, 0)),
        ],
        out_specs=pl.BlockSpec((tb, _D_ACT), lambda r: (r, 0)),
        compiler_params=cparams,
    )(x, w48, ss)

    out48 = out48[:B]
    if not concat_heads:
        return out48.reshape(B, 6, _N_PER_HEAD)
    # torch.cat(dim=0): heads sit along lanes -> transpose in the wrapper (extra HBM pass).
    return jnp.transpose(out48.reshape(B, 6, _N_PER_HEAD), (1, 0, 2)).reshape(
        6 * B, _N_PER_HEAD)


def init_params(key):
    """Deterministic parameter init mirroring the shapes of MyModule2 (weights pre-transposed)."""
    params = {}
    keys = jax.random.split(key, 18)
    for i, din in enumerate(_IN_DIMS):
        bound = 1.0 / float(din) ** 0.5
        params[f"w{i}"] = jax.random.uniform(
            keys[2 * i], (din, _N_PER_HEAD), jnp.float32, -bound, bound)
        params[f"b{i}"] = jax.random.uniform(
            keys[2 * i + 1], (1, _N_PER_HEAD), jnp.float32, -bound, bound)
    for j in range(3):  # non-trivial BN affine so the gamma/beta path is actually exercised
        params[f"g{j}"] = 1.0 + 0.1 * jax.random.normal(keys[12 + 2 * j], (1, _N_PER_HEAD),
                                                        jnp.float32)
        params[f"be{j}"] = 0.1 * jax.random.normal(keys[13 + 2 * j], (1, _N_PER_HEAD),
                                                   jnp.float32)
    return params


def reference_forward(x, params):
    """Pure-JAX reference for correctness checking (mirrors MyModule2.forward exactly)."""
    t0, t1, t2 = x[:, 0:6], x[:, 6:14], x[:, 14:24]

    def lin(v, i):
        return v @ params[f"w{i}"] + params[f"b{i}"]

    def bn(z, j):
        mu = jnp.mean(z, axis=0, keepdims=True)
        var = jnp.mean((z - mu) ** 2, axis=0, keepdims=True)
        return (z - mu) / jnp.sqrt(var + BN_EPS) * params[f"g{j}"] + params[f"be{j}"]

    a0 = bn(lin(t0 + 0.1, 0), 0)
    a1 = bn(lin(t1 + 0.2, 1), 1)
    a2 = bn(lin(t2 + 0.3, 2), 2)
    a3 = lin(jnp.sin(t0), 3)
    a4 = lin(jnp.cos(t1), 4)
    a5 = lin(jnp.sin(t2 * 0.5), 5)
    return jax.nn.sigmoid(jnp.concatenate([a0, a1, a2, a3, a4, a5], axis=0))


if __name__ == "__main__":
    key = jax.random.PRNGKey(0)
    pkey, xkey1, xkey2 = jax.random.split(key, 3)
    params = init_params(pkey)

    # Single-tile case.
    B1 = 16
    x1 = jax.random.normal(xkey1, (B1, 24), jnp.float32)
    out1 = jax.block_until_ready(mymodule2_forward(x1, params))
    ref1 = reference_forward(x1, params)
    assert out1.shape == (6 * B1, _N_PER_HEAD), out1.shape
    assert jnp.allclose(out1, ref1, atol=1e-5, rtol=1e-5), \
        float(jnp.max(jnp.abs(out1 - ref1)))

    # Multi-tile + batch-padding case (B=40, tile=16 -> 3 tiles, 8 zero-padded rows;
    # exercises the cross-tile BN partial-sum reduction and the padded-row handling).
    B2 = 40
    x2 = jax.random.normal(xkey2, (B2, 24), jnp.float32)
    out2 = jax.block_until_ready(mymodule2_forward(x2, params, max_rows_per_tile=16))
    ref2 = reference_forward(x2, params)
    assert out2.shape == (6 * B2, _N_PER_HEAD), out2.shape
    assert jnp.allclose(out2, ref2, atol=1e-5, rtol=1e-5), \
        float(jnp.max(jnp.abs(out2 - ref2)))

    print("KERNEL_OK")
</pallas_src>

<mosaic_0001>
module attributes {stable_mosaic.version = 11 : i64} {
  func.func @_stats_kernel(%arg0: i32, %arg1: memref<16x24xf32, #tpu.memory_space<vmem>>, %arg2: memref<24x24xf32, #tpu.memory_space<vmem>>, %arg3: memref<1x2x24xf32, #tpu.memory_space<vmem>>) attributes {dimension_semantics = [#tpu.dimension_semantics<parallel>], iteration_bounds = array<i64: 1>, scalar_prefetch = 0 : i64, scratch_operands = 0 : i64, tpu.core_type = #tpu.core_type<tc>, window_params = [{transform_indices = @transform_0, window_bounds = array<i64: 16, 24>}, {pipeline_mode = #tpu.pipeline_mode<synchronous>, transform_indices = @transform_1, window_bounds = array<i64: 24, 24>}, {transform_indices = @transform_2, window_bounds = array<i64: 1, 2, 24>}]} {
    %c0 = arith.constant 0 : index
    %c0_0 = arith.constant 0 : index
    %0 = vector.load %arg1[%c0, %c0_0] : memref<16x24xf32, #tpu.memory_space<vmem>>, vector<16x24xf32>
    %c0_1 = arith.constant 0 : index
    %c0_2 = arith.constant 0 : index
    %1 = vector.load %arg2[%c0_1, %c0_2] : memref<24x24xf32, #tpu.memory_space<vmem>>, vector<24x24xf32>
    %cst = arith.constant dense<0.000000e+00> : vector<16x24xf32>
    %2 = tpu.matmul %0, %1, %cst {dimension_numbers = #tpu.dot_dimension_numbers<[1], [0], [0], [1], [0, 0, 1, 1], [], []>} : vector<16x24xf32>, vector<24x24xf32>, vector<16x24xf32> -> vector<16x24xf32>
    %cst_3 = arith.constant dense<0.000000e+00> : vector<24xf32>
    %3 = vector.multi_reduction <add>, %2, %cst_3 [0] : vector<16x24xf32> to vector<24xf32>
    %4 = vector.shape_cast %3 : vector<24xf32> to vector<1x24xf32>
    %5 = vector.shape_cast %4 : vector<1x24xf32> to vector<1x1x24xf32>
    %c0_4 = arith.constant 0 : index
    %c0_5 = arith.constant 0 : index
    %c0_6 = arith.constant 0 : index
    %6 = vector.load %arg3[%c0_4, %c0_5, %c0_6] : memref<1x2x24xf32, #tpu.memory_space<vmem>>, vector<1x1x24xf32>
    tpu.vector_store %arg3[%c0_4, %c0_5, %c0_6], %5 {strides = array<i32>} : memref<1x2x24xf32, #tpu.memory_space<vmem>>, vector<1x1x24xf32>,
    %7 = arith.mulf %2, %2 : vector<16x24xf32>
    %cst_7 = arith.constant dense<0.000000e+00> : vector<24xf32>
    %8 = vector.multi_reduction <add>, %7, %cst_7 [0] : vector<16x24xf32> to vector<24xf32>
    %9 = vector.shape_cast %8 : vector<24xf32> to vector<1x24xf32>
    %10 = vector.shape_cast %9 : vector<1x24xf32> to vector<1x1x24xf32>
    %c0_8 = arith.constant 0 : index
    %c1 = arith.constant 1 : index
    %c0_9 = arith.constant 0 : index
    %11 = vector.load %arg3[%c0_8, %c1, %c0_9] : memref<1x2x24xf32, #tpu.memory_space<vmem>>, vector<1x1x24xf32>
    tpu.vector_store %arg3[%c0_8, %c1, %c0_9], %10 {strides = array<i32>} : memref<1x2x24xf32, #tpu.memory_space<vmem>>, vector<1x1x24xf32>,
    return
  }
  func.func @transform_0(%arg0: i32) -> (i32, i32) {
    %c0_i32 = arith.constant 0 : i32
    %c0_i32_0 = arith.constant 0 : i32
    return %arg0, %c0_i32 : i32, i32
  }
  func.func @transform_1(%arg0: i32) -> (i32, i32) {
    %c0_i32 = arith.constant 0 : i32
    %c0_i32_0 = arith.constant 0 : i32
    %c0_i32_1 = arith.constant 0 : i32
    return %c0_i32, %c0_i32_0 : i32, i32
  }
  func.func @transform_2(%arg0: i32) -> (i32, i32, i32) {
    %c0_i32 = arith.constant 0 : i32
    %c0_i32_0 = arith.constant 0 : i32
    %c0_i32_1 = arith.constant 0 : i32
    return %arg0, %c0_i32, %c0_i32_0 : i32, i32, i32
  }
}

</mosaic_0001>

<bundles_post_ra>
// kernel: tpu_custom_call.1
= control target key start
LH: loop header
LB: loop body
LE: loop exit
PB: predicated region body
PF: predicated region fallthrough
CT: control target
= control target key end

     0   :  { %7 = vsyncpa [#allocation3], 0  ;;  %s325_s0 = inlined_call_operand.hbm [shape: f32[16,24], index: 0, kind: input, shape index: {}]   ;;  %s326_s1 = inlined_call_operand.hbm [shape: f32[24,24], index: 1, kind: input, shape index: {}]   ;;  %s327_s2 = inlined_call_operand.hbm [shape: f32[1,2,24], index: 2, kind: output, shape index: {}]  }
   0x1   :  { %8 = vsyncpa [#allocation6], 0 }
   0x2   :  { %9 = vsyncpa [#allocation4], 0  ;;  %s263_s9 = smov [#allocation2]   ;;  %s191_s13 = scalar_lea.hbm %s325_s0, 256 }
   0x3   :  { %s15_s10 = sshll.u32 %s263_s9, 4  ;;  %p192_p0 = scmp.ne.s32.totalorder %s325_s0, %s191_s13  ;;  %s16_s10 = int_to_ptr.vmem [resolvable:$true] %s15_s10 }
   0x4   :  { %p195_p1 = scmp.lt.u32.totalorder %s191_s13, %s325_s0 }
   0x6   :  { %p197_p2 = pnand %p195_p1, %p192_p0 }
   0x8   :  { %200 = shalt.err (!%p197_p2)
}
   0x9   :  { %s201_s18 = scalar_lea.vmem %s16_s10, 256  ;;  %p206_p4 = scmp.lt.s32.totalorder %s16_s10, %s16_s10 }
   0xa   :  { %p202_p3 = scmp.ne.s32.totalorder %s16_s10, %s201_s18  ;;  %p207_p5 = scmp.lt.s32.totalorder %s201_s18, %s201_s18 }
   0xc   :  { %p208_p6 = por %p207_p5, %p206_p4 }
   0xe   :  { %p209_p7 = pnand %p208_p6, %p202_p3 }
  0x10   :  { %212 = shalt.err (!%p209_p7)
}
  0x11   :  { %s264_s19 = smov 128   ;;  %s265_s20 = smov 8  }
  0x12   :  { %21 = dma.hbm_to_vmem [thread:$0]  %s325_s0, 256, %s16_s10, [#allocation3], %s264_s19, %s264_s19, %s265_s20  }
  0x13   :  { %s266_s23 = smov [#allocation5]   ;;  %s213_s27 = scalar_lea.hbm %s326_s1, 384 }
  0x14   :  { %s27_s24 = sshll.u32 %s266_s23, 4  ;;  %p214_p8 = scmp.ne.s32.totalorder %s326_s1, %s213_s27  ;;  %s28_s24 = int_to_ptr.vmem [resolvable:$true] %s27_s24 }
  0x15   :  { %p217_p9 = scmp.lt.u32.totalorder %s213_s27, %s326_s1 }
  0x17   :  { %p219_p10 = pnand %p217_p9, %p214_p8 }
  0x19   :  { %222 = shalt.err (!%p219_p10)
}
  0x1a   :  { %s223_s4 = scalar_lea.vmem %s28_s24, 384  ;;  %p228_p12 = scmp.lt.s32.totalorder %s28_s24, %s28_s24 }
  0x1b   :  { %p224_p11 = scmp.ne.s32.totalorder %s28_s24, %s223_s4  ;;  %p229_p13 = scmp.lt.s32.totalorder %s223_s4, %s223_s4 }
  0x1d   :  { %p230_p0 = por %p229_p13, %p228_p12 }
  0x1f   :  { %p231_p1 = pnand %p230_p0, %p224_p11 }
  0x21   :  { %234 = shalt.err (!%p231_p1)
}
  0x22   :  { %33 = dma.hbm_to_vmem [thread:$0]  %s326_s1, 384, %s28_s24, [#allocation6], %s264_s19, %s264_s19, %s265_s20  }
  0x23   :  { %257 = dma.done.wait [#allocation3], 256  }
  0x24   :  { %258 = vsyncadd [#allocation3], 4294967040 }
  0x25   :  { %259 = dma.done.wait [#allocation6], 384  }
  0x26   :  { %260 = vsyncadd [#allocation6], 4294966912  ;;  %vm45_vm0 = vcmask 195584   ;;  %v42_v0 = vld [vmem:[#allocation5] sm:$0xff]  ;;  %v43_v1 = vld [vmem:[#allocation5 + $0x8] sm:$0xff]  ;;  %vm136_vm1 = vcmask 188416  }
  0x27   :  { %v182_v2 = vpack.c.bf16 %v43_v1, %v42_v0  ;;  %v40_v3 = vld [vmem:[#allocation2] sm:$0xff]  ;;  %v41_v5 = vld [vmem:[#allocation2 + $0x8] sm:$0xff]  ;;  %s267_s1 = smov [#allocation7]  }
  0x28   :  { %v44_v4 = vld [vmem:[#allocation5 + $0x10] sm:$0xff]  ;;  %179 = vmatprep.mubr.msk.f32.mxu0 %vm45_vm0, %v40_v3  ;;  %s156_s6 = sshll.u32 %s267_s1, 4  ;;  %s157_s6 = int_to_ptr.vmem [resolvable:$true] %s156_s6 }
  0x29   :  { %183 = vmatprep.subr.bf16.mxu0 %v182_v2  ;;  %s235_s7 = scalar_lea.vmem %s157_s6, 32  ;;  %p240_p3 = scmp.lt.s32.totalorder %s157_s6, %s157_s6 }
  0x2a   :  { %185 = vmatpush3.bf16.msra.mxu0 %v182_v2  ;;  %p236_p2 = scmp.ne.s32.totalorder %s157_s6, %s235_s7  ;;  %p241_p4 = scmp.lt.s32.totalorder %s235_s7, %s235_s7 }
  0x2b   :  { %177 = vmatprep.subr.mxu0 %v44_v4 }
  0x2c   :  { %p242_p5 = por %p241_p4, %p240_p3 }
  0x2e   :  { %178 = vmatpush3.msra.mxu0 %v44_v4  ;;  %p243_p6 = pnand %p242_p5, %p236_p2 }
  0x2f   :  { %180 = vmatmul.mubr.msk.f32.vlgmr.msra.gmra.mrb[0].mxu0 %vm45_vm0, %v41_v5 }
 0x102   :  { %v181_v6 = vpop.f32.mrb[0].mxu0 }
 0x103   :  { %v128_v7 = vsel %vm45_vm0, %v181_v6, 0.0  ;;  %v139_v8 = vmul.f32 %v181_v6, %v181_v6  ;;  %v118_v9 = vpop.f32.mrb[1].mxu0 }
 0x104   :  { %v127_v10 = vsel %vm45_vm0, %v118_v9, 0.0  ;;  %v138_v11 = vmul.f32 %v118_v9, %v118_v9 }
 0x105   :  { %v141_v12 = vsel %vm45_vm0, %v139_v8, 0.0  ;;  %v129_v13 = vadd.f32 %v128_v7, %v127_v10 }
 0x106   :  { %v140_v14 = vsel %vm45_vm0, %v138_v11, 0.0 }
 0x107   :  { %v130_v15 = vrot.slane %v129_v13, 4  ;;  %v142_v16 = vadd.f32 %v141_v12, %v140_v14 }
 0x109   :  { %v131_v17 = vadd.f32 %v130_v15, %v129_v13  ;;  %v143_v18 = vrot.slane %v142_v16, 4 }
 0x10b   :  { %v132_v19 = vrot.slane %v131_v17, 2  ;;  %v144_v20 = vadd.f32 %v143_v18, %v142_v16 }
 0x10d   :  { %v133_v21 = vadd.f32 %v132_v19, %v131_v17  ;;  %v145_v22 = vrot.slane %v144_v20, 2 }
 0x10f   :  { %v134_v23 = vrot.slane %v133_v21, 1  ;;  %v146_v24 = vadd.f32 %v145_v22, %v144_v20 }
 0x111   :  { %v135_v25 = vadd.f32 %v134_v23, %v133_v21  ;;  %v147_v26 = vrot.slane %v146_v24, 1 }
 0x113   :  { %137 = vst.msk [vmem:[#allocation7] sm:$0x1] %vm136_vm1, %v135_v25  ;;  %v148_v27 = vadd.f32 %v147_v26, %v146_v24 }
 0x115   :  { %149 = vst.msk [vmem:[#allocation7 + $0x1] sm:$0x1] %vm136_vm1, %v148_v27 }
 0x116   :  { %246 = shalt.err (!%p243_p6)
}
 0x117   :  { %s247_s10 = scalar_lea.hbm %s327_s2, 32 }
 0x118   :  { %p248_p7 = scmp.ne.s32.totalorder %s327_s2, %s247_s10  ;;  %p251_p8 = scmp.lt.u32.totalorder %s247_s10, %s327_s2 }
 0x11a   :  { %p253_p9 = pnand %p251_p8, %p248_p7 }
 0x11c   :  { %256 = shalt.err (!%p253_p9)
}
 0x11d   :  { %159 = dma.vmem_to_hbm [thread:$0]  %s157_s6, 32, %s327_s2, [#allocation4]  }
 0x11e   :  { %261 = dma.done.wait [#allocation4], 32  }
 0x11f   :  { %262 = vsyncadd [#allocation4], 4294967264 }
 0x120   :  { %163 = vsyncpa [#allocation3], 1 }
 0x121   :  { %164 = vsyncpa [#allocation6], 1 }
 0x122   :  { %165 = vsyncpa [#allocation4], 1 }

</bundles_post_ra>
